<compile_context>
chip_gen: v5e
topology: v5e:2x2
jax: 0.10.0
libtpu: 0.0.40
codegen_flags: <defaults>
</compile_context>

<pallas_src>
import jax
import jax.numpy as jnp
from jax import lax
from jax.experimental import pallas as pl
from jax.experimental.pallas import tpu as pltpu

K = 5          # conv kernel size (5, 5)
PAD = 2        # padding (2, 2)
BN_EPS = 1e-5  # nn.BatchNorm2d default eps


def _round_up(x, m):
    return (x + m - 1) // m * m


# -----------------------------------------------------------------------------------
# pltpu.roll direction probe: returns s such that pltpu.roll(x, s*d, axis) realizes
# result[q] = x[(q + d) mod n].  (pltpu.roll follows jnp.roll, i.e. s = -1; this tiny
# probe pins the convention on the actual backend so a sign flip can never silently
# corrupt the conv taps.)
# -----------------------------------------------------------------------------------
_ROLL_SIGN = None


def _roll_sign():
    global _ROLL_SIGN
    if _ROLL_SIGN is None:
        def probe(x_ref, o_ref):
            o_ref[...] = pltpu.roll(x_ref[...], 1, 1)

        x = jnp.broadcast_to(jnp.arange(128, dtype=jnp.float32)[None, :], (8, 128))
        y = pl.pallas_call(
            probe, out_shape=jax.ShapeDtypeStruct((8, 128), jnp.float32))(x)
        y00 = int(jax.device_get(y)[0, 0])
        if y00 == 127:        # jnp.roll convention: result[i] = x[i - shift]
            _ROLL_SIGN = -1
        elif y00 == 1:        # opposite convention: result[i] = x[i + shift]
            _ROLL_SIGN = 1
        else:
            raise RuntimeError(f"unexpected pltpu.roll behaviour (probe got {y00})")
    return _ROLL_SIGN


def dense_block_forward(x_nchw, params):
    """Forward pass of dense_block. Input/output in PyTorch NCHW layout (float32)."""
    N, c0, H, W = x_nchw.shape
    L = len(params)                              # num_layers
    g = params[0]["w"].shape[0]                  # growth_rate
    Hp, Wp = H + 2 * PAD, W + 2 * PAD
    HWp = Hp * Wp
    lanes = _round_up(HWp, 128)                  # lane-dense, 128-aligned spatial extent
    c_tot = c0 + L * g
    c_buf = _round_up(c_tot, 8)                  # channel rows of the concat buffer
    cs = [_round_up(c0 + l * g, 8) for l in range(L)]   # live-channel rows per layer
    k_max = K * cs[-1]                           # widest folded contraction dim
    sgn = _roll_sign()                           # static python int

    # --- wrapper-side data prep (tiny, traceable) --------------------------------
    # Input: spatial zero-pad once, flatten spatial to lanes, pad lanes to 128-multiple
    # (the lane padding doubles as the required zeros beyond the padded frame).
    xp = jnp.pad(x_nchw, ((0, 0), (0, 0), (PAD, PAD), (PAD, PAD)))
    xp = xp.reshape(N, c0, HWp)
    xp = jnp.pad(xp, ((0, 0), (0, 0), (0, lanes - HWp))).astype(jnp.float32)

    # Interior mask over the padded + lane-aligned extent (zeros at halo + lane pad).
    imask = jnp.pad(jnp.ones((H, W), jnp.float32), PAD).reshape(1, HWp)
    imask = jnp.pad(imask, ((0, 0), (0, lanes - HWp)))

    # Weights: per-(layer, ky) lane-dense slabs of shape (g, K*cs_l): the kx taps are
    # folded into the contraction dim; input channels are permuted from torch's concat
    # order ([out_{l-1},...,out_0,x]) to the buffer order ([x,out_0,...,out_{l-1}]).
    w_list, sc_list, sh_list = [], [], []
    for l, p in enumerate(params):
        c_in = c0 + l * g
        perm = [l * g + c for c in range(c0)] + \
               [(l - 1 - m) * g + j for m in range(l) for j in range(g)]
        w_buf = p["w"][:, perm, :, :].astype(jnp.float32)          # (g, c_in, K, K)
        pad_c = cs[l] - c_in
        slabs = []
        for ky in range(K):
            blocks = [jnp.pad(w_buf[:, :, ky, kx], ((0, 0), (0, pad_c)))
                      for kx in range(K)]                          # (g, cs_l) each
            slab = jnp.concatenate(blocks, axis=1)                 # (g, K*cs_l)
            slab = jnp.pad(slab, ((0, 0), (0, k_max - K * cs[l])))
            slabs.append(slab)
        w_list.append(jnp.stack(slabs, axis=0))                    # (K, g, k_max)
        scale = p["gamma"] / jnp.sqrt(p["var"] + BN_EPS)
        shift = p["beta"] + scale * (p["b"] - p["mean"])
        sc_list.append(scale.reshape(g, 1).astype(jnp.float32))
        sh_list.append(shift.reshape(g, 1).astype(jnp.float32))
    w_all = jnp.stack(w_list, axis=0)                              # (L, K, g, k_max)
    scale_all = jnp.stack(sc_list)                                 # (L, g, 1)
    shift_all = jnp.stack(sh_list)                                 # (L, g, 1)

    # --- the fused kernel ----------------------------------------------------------
    def kernel(x_ref, w_ref, scale_ref, shift_ref, imask_ref, o_ref):
        # o_ref doubles as the channel-concat activation buffer (order [x, out_0, ...]).
        # Zero once per grid step: halo/lane-pad regions must read as zero and the
        # zero-weighted padding rows must not hold NaN garbage (0 * NaN = NaN).
        o_ref[...] = jnp.zeros(o_ref.shape, o_ref.dtype)
        o_ref[0, 0:c0, :] = x_ref[0]              # lane-aligned, lane-dense input drop
        imask = imask_ref[...]                    # (1, lanes)

        for l in range(L):                        # static unroll (small L)
            c_in = c0 + l * g
            csl = cs[l]
            # 5 kx-shifted copies of the live channel rows via XLU rolls, folded into
            # the contraction dim (no lane-unaligned slice relayouts).
            base = o_ref[0, 0:csl, :]             # (csl, lanes), sublane/lane aligned
            pieces = []
            for kx in range(K):
                d = kx - PAD
                pieces.append(base if d == 0
                              else pltpu.roll(base, (sgn * d) % lanes, 1))
            xop = jnp.concatenate(pieces, axis=0)  # (K*csl, lanes)

            # 5 matmuls (one per ky) accumulated in registers; the ky offset is a whole
            # padded-row shift applied to the small (g, lanes) partial via an XLU roll.
            acc = None
            for ky in range(K):
                w = w_ref[l, ky, :, 0:K * csl]     # (g, K*csl) lane-dense weight slab
                part = jnp.dot(w, xop, preferred_element_type=jnp.float32)
                d = (ky - PAD) * Wp
                if d != 0:
                    part = pltpu.roll(part, (sgn * d) % lanes, 1)
                acc = part if acc is None else acc + part

            # Fused BatchNorm(eval) + conv bias + ReLU (f32 VPU); re-zero halo / lane
            # padding so the next layer sees correct zero padding.  Dropout: identity.
            y = jnp.maximum(acc * scale_ref[l] + shift_ref[l], 0.0) * imask
            o_ref[0, c_in:c_in + g, :] = y

    out = pl.pallas_call(
        kernel,
        out_shape=jax.ShapeDtypeStruct((N, c_buf, lanes), jnp.float32),
        grid_spec=pltpu.PrefetchScalarGridSpec(
            num_scalar_prefetch=0,
            grid=(N,),
            in_specs=[
                pl.BlockSpec((1, c0, lanes), lambda n: (n, 0, 0)),
                pl.BlockSpec((L, K, g, k_max), lambda n: (0, 0, 0, 0)),
                pl.BlockSpec((L, g, 1), lambda n: (0, 0, 0)),
                pl.BlockSpec((L, g, 1), lambda n: (0, 0, 0)),
                pl.BlockSpec((1, lanes), lambda n: (0, 0)),
            ],
            out_specs=pl.BlockSpec((1, c_buf, lanes), lambda n: (n, 0, 0)),
        ),
        compiler_params=pltpu.CompilerParams(dimension_semantics=("parallel",)),
    )(xp, w_all, scale_all, shift_all, imask)

    # (N, c_buf, lanes): restore torch concat order [out_{L-1},...,out_0,x], drop the
    # channel/lane padding, crop the spatial halo -> NCHW.
    out_perm = [c0 + (L - 1 - (t // g)) * g + (t % g) for t in range(L * g)] \
        + list(range(c0))
    out = jnp.take(out[:, :, :HWp], jnp.asarray(out_perm), axis=1)
    out = out.reshape(N, c_tot, Hp, Wp)[:, :, PAD:PAD + H, PAD:PAD + W]
    return out


def init_dense_block_params(key, in_channel, growth_rate, num_layers):
    """Deterministic synthetic parameters for each conv_block layer."""
    params = []
    channel = in_channel
    for i in range(num_layers):
        k = jax.random.fold_in(key, i)
        kw, kb, kg, kbe, km, kv = jax.random.split(k, 6)
        w_oihw = 0.1 * jax.random.normal(kw, (growth_rate, channel, K, K), jnp.float32)
        bias = 0.1 * jax.random.normal(kb, (growth_rate,), jnp.float32)
        gamma = 1.0 + 0.1 * jax.random.normal(kg, (growth_rate,), jnp.float32)
        beta = 0.1 * jax.random.normal(kbe, (growth_rate,), jnp.float32)
        run_mean = 0.1 * jax.random.normal(km, (growth_rate,), jnp.float32)
        run_var = jnp.abs(jax.random.normal(kv, (growth_rate,), jnp.float32)) + 0.5
        params.append(dict(w=w_oihw, b=bias, gamma=gamma, beta=beta,
                           mean=run_mean, var=run_var))
        channel += growth_rate
    return params


def dense_block_reference(x_nchw, params):
    """Pure-JAX reference (lax.conv) for correctness checking."""
    x = x_nchw
    for p in params:
        y = lax.conv_general_dilated(x, p["w"], (1, 1), ((PAD, PAD), (PAD, PAD)),
                                     dimension_numbers=("NCHW", "OIHW", "NCHW"))
        y = y + p["b"][None, :, None, None]
        scale = (p["gamma"] / jnp.sqrt(p["var"] + BN_EPS))[None, :, None, None]
        y = (y - p["mean"][None, :, None, None]) * scale + p["beta"][None, :, None, None]
        y = jnp.maximum(y, 0.0)
        x = jnp.concatenate([y, x], axis=1)   # torch.cat((out, x), dim=1)
    return x


if __name__ == "__main__":
    # dense_block(in_channel=4, growth_rate=4, num_layers=2, drop=0.1) at small shapes
    N, C, H, W = 2, 4, 16, 16
    growth_rate, num_layers = 4, 2

    _roll_sign()   # pin the pltpu.roll direction on-device before tracing the kernel

    key = jax.random.PRNGKey(0)
    kx, kp = jax.random.split(key)
    x = jax.random.normal(kx, (N, C, H, W), jnp.float32)
    params = init_dense_block_params(kp, C, growth_rate, num_layers)

    fwd = jax.jit(dense_block_forward)
    out = jax.block_until_ready(fwd(x, params))

    expected_channels = C + growth_rate * num_layers
    assert out.shape == (N, expected_channels, H, W), out.shape

    ref = jax.block_until_ready(dense_block_reference(x, params))
    assert jnp.allclose(out, ref, atol=1e-4, rtol=1e-4), \
        float(jnp.max(jnp.abs(out - ref)))

    print("KERNEL_OK")
</pallas_src>

<mosaic_0001>
module attributes {stable_mosaic.version = 11 : i64} {
  func.func @probe(%arg0: memref<8x128xf32, #tpu.memory_space<vmem>>, %arg1: memref<8x128xf32, #tpu.memory_space<vmem>>) attributes {dimension_semantics = [], scalar_prefetch = 0 : i64, scratch_operands = 0 : i64, tpu.core_type = #tpu.core_type<tc>} {
    %c0 = arith.constant 0 : index
    %c0_0 = arith.constant 0 : index
    %0 = vector.load %arg0[%c0, %c0_0] : memref<8x128xf32, #tpu.memory_space<vmem>>, vector<8x128xf32>
    %c1_i32 = arith.constant 1 : i32
    %1 = tpu.dynamic_rotate %0 by %c1_i32 dim 1 : vector<8x128xf32>, i32 -> vector<8x128xf32>
    %c0_1 = arith.constant 0 : index
    %c0_2 = arith.constant 0 : index
    %2 = vector.load %arg1[%c0_1, %c0_2] : memref<8x128xf32, #tpu.memory_space<vmem>>, vector<8x128xf32>
    tpu.vector_store %arg1[%c0_1, %c0_2], %1 {strides = array<i32>} : memref<8x128xf32, #tpu.memory_space<vmem>>, vector<8x128xf32>,
    return
  }
}

</mosaic_0001>

<bundles_post_ra>
// kernel: tpu_custom_call.1
= control target key start
LH: loop header
LB: loop body
LE: loop exit
PB: predicated region body
PF: predicated region fallthrough
CT: control target
= control target key end

     0   :  { %6 = vsyncpa [#allocation3], 0  ;;  %s118_s0 = inlined_call_operand.hbm [shape: f32[8,128], index: 0, kind: input, shape index: {}]   ;;  %s119_s1 = inlined_call_operand.hbm [shape: f32[8,128], index: 1, kind: output, shape index: {}]  }
   0x1   :  { %7 = vsyncpa [#allocation4], 0  ;;  %s13_s8 = sshll.u32 %s118_s0, 4  ;;  %s99_s9 = smov [#allocation2]   ;;  %s14_s8 = int_to_ptr.hbm [resolvable:$true] %s13_s8 }
   0x2   :  { %s15_s10 = sshll.u32 %s99_s9, 4  ;;  %s16_s10 = int_to_ptr.vmem [resolvable:$true] %s15_s10 }
   0x3   :  { %18 = dma.hbm_to_vmem [thread:$0]  %s14_s8, 128, %s16_s10, [#allocation3]  }
   0x4   :  { %95 = dma.done.wait [#allocation3], 128  }
   0x5   :  { %96 = vsyncadd [#allocation3], 4294967168  ;;  %v23_v0 = vld [vmem:[#allocation2] sm:$0xff]  ;;  %s100_s11 = smov 1   ;;  %s101_s12 = smov [#allocation5]  }
   0x6   :  { %24 = vrot.lane.b32.xlu0 %v23_v0, %s100_s11  ;;  %s32_s13 = sshll.u32 %s101_s12, 4  ;;  %s34_s16 = sshll.u32 %s119_s1, 4  ;;  %s33_s13 = int_to_ptr.vmem [resolvable:$true] %s32_s13  ;;  %s35_s16 = int_to_ptr.hbm [resolvable:$true] %s34_s16 }
  0x78   :  { %v25_v1 = vpop.permute.xlu0 %24 }
  0x79   :  { %26 = vst [vmem:[#allocation5] sm:$0xff] %v25_v1 }
  0x7a   :  { %37 = dma.vmem_to_hbm [thread:$0]  %s33_s13, 128, %s35_s16, [#allocation4]  }
  0x7b   :  { %97 = dma.done.wait [#allocation4], 128  }
  0x7c   :  { %98 = vsyncadd [#allocation4], 4294967168 }
  0x7d   :  { %42 = vsyncpa [#allocation3], 1 }
  0x7e   :  { %43 = vsyncpa [#allocation4], 1 }

</bundles_post_ra>
